<compile_context>
chip_gen: v6e
topology: v6e:2x2x1
jax: 0.10.0
libtpu: 0.0.40
codegen_flags: <defaults>
</compile_context>

<pallas_src>
import functools
import math

import jax
import jax.numpy as jnp
from jax.experimental import pallas as pl
from jax.experimental.pallas import tpu as pltpu


_LANE = 128      # feature dims padded to a multiple of the 128-lane vreg width
_SUBLANE = 16    # bf16 sublane packing: keep row tiles a multiple of 16

# 1 = single-buffer the grid-invariant weight/LN-param blocks (preferred);
# flipped to 2 once if pl.Buffered(1) is unsupported by the jax version.
_WEIGHT_BUFFERS = [1]


def _round_up(x, m):
    return (x + m - 1) // m * m


def _projection_kernel(x_ref, w1_ref, w2_ref, gamma_ref, beta_ref, o_ref,
                       *, d_out, eps, approximate_gelu):
    # x_ref:     (TM, d_in_p)       input rows (bf16, or f32 on the fast path)
    # w1_ref:    (d_in_p, d_out_p)  bf16 (pre-transposed, zero-padded)
    # w2_ref:    (d_out_p, d_out_p) bf16 (pre-transposed, zero-padded)
    # gamma_ref: (1, d_out_p)       f32 (zero-padded)
    # beta_ref:  (1, d_out_p)       f32 (zero-padded)
    # o_ref:     (TM, d_out_p)      x.dtype
    w_dtype = w1_ref.dtype

    x = x_ref[...]
    if x.dtype != w_dtype:
        x = x.astype(w_dtype)

    # embed1 = linear1(x) -- bf16 operands on the MXU, f32 accumulation.
    e1 = jnp.dot(x, w1_ref[...], preferred_element_type=jnp.float32)

    if approximate_gelu:
        # tanh-approx GELU: runs on the EUP (free VLIW slot); slight deviation
        # from PyTorch's exact-erf default.
        c = math.sqrt(2.0 / math.pi)
        g = 0.5 * e1 * (1.0 + jnp.tanh(c * (e1 + 0.044715 * (e1 * e1 * e1))))
    else:
        # F.gelu (exact, erf-based -- PyTorch default), f32 epilogue.
        g = 0.5 * e1 * (1.0 + jax.lax.erf(e1 * (1.0 / math.sqrt(2.0))))

    # embed2 = linear2(gelu(embed1)); dropout is identity in eval mode.
    e2 = jnp.dot(g.astype(w_dtype), w2_ref[...],
                 preferred_element_type=jnp.float32)

    s = e1 + e2

    # One-pass LayerNorm moments over the real d_out features.  Padded feature
    # columns of s are exactly zero (zero-padded inputs & weights), so the
    # unmasked sums already only see the real features; zeroed gamma/beta pads
    # keep padded output columns at zero.
    inv_d = 1.0 / d_out
    mean = jnp.sum(s, axis=-1, keepdims=True) * inv_d
    ex2 = jnp.sum(s * s, axis=-1, keepdims=True) * inv_d
    var = jnp.maximum(ex2 - mean * mean, 0.0)   # guard f32 cancellation
    normed = (s - mean) * jax.lax.rsqrt(var + eps)

    o_ref[...] = (normed * gamma_ref[...] + beta_ref[...]).astype(o_ref.dtype)


def prepare_projection_params(w1, w2, gamma, beta, *,
                              compute_dtype=jnp.bfloat16):
    """One-time layout prep (outside the hot path).

    w1: (d_out, d_in), w2: (d_out, d_out) in PyTorch nn.Linear layout.
    Returns transposed (x @ W) weights, zero-padded to lane multiples of 128,
    cast to the MXU compute dtype; gamma/beta padded and kept in f32.
    """
    d_out, d_in = w1.shape
    d_in_p = _round_up(d_in, _LANE)
    d_out_p = _round_up(d_out, _LANE)

    w1_t = jnp.zeros((d_in_p, d_out_p), compute_dtype).at[:d_in, :d_out].set(
        jnp.transpose(w1).astype(compute_dtype))
    w2_t = jnp.zeros((d_out_p, d_out_p), compute_dtype).at[:d_out, :d_out].set(
        jnp.transpose(w2).astype(compute_dtype))
    gamma_p = jnp.zeros((1, d_out_p), jnp.float32).at[:, :d_out].set(
        gamma.reshape(1, d_out).astype(jnp.float32))
    beta_p = jnp.zeros((1, d_out_p), jnp.float32).at[:, :d_out].set(
        beta.reshape(1, d_out).astype(jnp.float32))

    return dict(w1=w1_t, w2=w2_t, gamma=gamma_p, beta=beta_p,
                d_in=d_in, d_out=d_out, compute_dtype=compute_dtype)


def _vmem_limit_bytes():
    # ~80% of physical VMEM: headroom for internal scratch / semaphores;
    # scales from v7x (64 MiB/TC) up to v5e/v6e (128 MiB).
    try:
        cap = pltpu.get_tpu_info().vmem_capacity_bytes
    except Exception:
        cap = 128 * 1024 * 1024
    return int(cap * 0.8)


def _call_projection(x_in, w1, w2, gamma, beta, *, tile_m, d_out, eps,
                     approximate_gelu, out_dtype, weight_buffers):
    n_p, d_in_blk = x_in.shape
    d_in_p, d_out_p = w1.shape

    # Grid-invariant blocks (constant index_map): single-buffer to save VMEM.
    inv_kwargs = {}
    if weight_buffers == 1:
        inv_kwargs = dict(pipeline_mode=pl.Buffered(1))

    kernel = functools.partial(_projection_kernel, d_out=d_out, eps=eps,
                               approximate_gelu=approximate_gelu)

    return pl.pallas_call(
        kernel,
        out_shape=jax.ShapeDtypeStruct((n_p, d_out_p), out_dtype),
        grid_spec=pltpu.PrefetchScalarGridSpec(
            num_scalar_prefetch=0,
            grid=(n_p // tile_m,),
            in_specs=[
                pl.BlockSpec((tile_m, d_in_blk), lambda i: (i, 0)),
                pl.BlockSpec((d_in_p, d_out_p), lambda i: (0, 0), **inv_kwargs),
                pl.BlockSpec((d_out_p, d_out_p), lambda i: (0, 0), **inv_kwargs),
                pl.BlockSpec((1, d_out_p), lambda i: (0, 0), **inv_kwargs),
                pl.BlockSpec((1, d_out_p), lambda i: (0, 0), **inv_kwargs),
            ],
            out_specs=pl.BlockSpec((tile_m, d_out_p), lambda i: (i, 0)),
        ),
        compiler_params=pltpu.CompilerParams(
            dimension_semantics=("parallel",),
            vmem_limit_bytes=_vmem_limit_bytes(),
        ),
    )(x_in, w1, w2, gamma, beta)


def projection_forward(x, params, *, tile_m=None, eps=1e-5,
                       approximate_gelu=False):
    """x: [..., d_in].  params from prepare_projection_params()."""
    d_in = params["d_in"]
    d_out = params["d_out"]
    w1, w2 = params["w1"], params["w2"]
    gamma, beta = params["gamma"], params["beta"]
    compute_dtype = params["compute_dtype"]
    d_in_p, d_out_p = w1.shape

    lead_shape = x.shape[:-1]
    x2d = x.reshape(-1, d_in)
    n = x2d.shape[0]

    # Row tile: large enough to feed the MXU and amortize per-step pipeline
    # overhead; smaller when d_out is big (bounds f32 intermediates); split
    # into >= 2 grid steps when the row count allows (megacore / DMA overlap).
    if tile_m is None:
        tile_m = 256 if d_out_p >= 4096 else 512
    n_rounded = _round_up(n, _SUBLANE)
    tile_m = min(tile_m, n_rounded)
    if n_rounded >= 2 * _SUBLANE:
        tile_m = min(tile_m, _round_up(n_rounded // 2, _SUBLANE))
    tile_m = _round_up(max(tile_m, _SUBLANE), _SUBLANE)
    n_p = _round_up(n, tile_m)

    # Fast path: x already lane-aligned and row-divisible -> skip the per-call
    # pad/cast HBM pass; any f32->bf16 cast happens inside the kernel.
    if d_in == d_in_p and n_p == n:
        x_in = x2d
    else:
        x_in = jnp.zeros((n_p, d_in_p), compute_dtype).at[:n, :d_in].set(
            x2d.astype(compute_dtype))

    out_dtype = x.dtype
    call = functools.partial(
        _call_projection, x_in, w1, w2, gamma, beta,
        tile_m=tile_m, d_out=d_out, eps=eps,
        approximate_gelu=approximate_gelu, out_dtype=out_dtype)
    try:
        out = call(weight_buffers=_WEIGHT_BUFFERS[0])
    except Exception:
        if _WEIGHT_BUFFERS[0] != 1:
            raise
        # TODO(synk): remove this fallback once pl.Buffered(1) single-buffering
        # of grid-invariant blocks is guaranteed by the deployed jax version.
        _WEIGHT_BUFFERS[0] = 2
        out = call(weight_buffers=2)

    if n_p != n or d_out_p != d_out:
        out = out[:n, :d_out]
    return out.reshape(*lead_shape, d_out)


def _reference_forward(x, w1, w2, gamma, beta):
    """Pure-JAX f32 reference mirroring the PyTorch module (eval mode)."""
    e1 = x @ w1.T
    g = 0.5 * e1 * (1.0 + jax.lax.erf(e1 / jnp.sqrt(2.0)))
    e2 = g @ w2.T
    s = e1 + e2
    mean = jnp.mean(s, axis=-1, keepdims=True)
    var = jnp.mean((s - mean) ** 2, axis=-1, keepdims=True)
    return (s - mean) * jax.lax.rsqrt(var + 1e-5) * gamma + beta


if __name__ == "__main__":
    # Small shapes implied by the module: x is [batch, seq, d_in].
    batch, seq, d_in, d_out = 2, 8, 32, 32

    key = jax.random.PRNGKey(0)
    kx, k1, k2, kr, kx3, k13, k23, kg3, kb3 = jax.random.split(key, 9)

    x = jax.random.normal(kx, (batch, seq, d_in), dtype=jnp.float32)

    # Deterministic parameter init (PyTorch Linear-style uniform bounds).
    bound1 = 1.0 / math.sqrt(d_in)
    bound2 = 1.0 / math.sqrt(d_out)
    w1 = jax.random.uniform(k1, (d_out, d_in), jnp.float32, -bound1, bound1)
    w2 = jax.random.uniform(k2, (d_out, d_out), jnp.float32, -bound2, bound2)
    gamma = jnp.ones((d_out,), jnp.float32)   # LayerNorm default weight
    beta = jnp.zeros((d_out,), jnp.float32)   # LayerNorm default bias

    params = prepare_projection_params(w1, w2, gamma, beta)

    out = jax.block_until_ready(projection_forward(x, params))
    ref = _reference_forward(x, w1, w2, gamma, beta)
    assert out.shape == (batch, seq, d_out)
    assert out.dtype == x.dtype
    err = float(jnp.max(jnp.abs(out - ref)))
    # bf16 MXU operands with f32 accumulation -> bf16-level tolerance.
    assert err < 5e-2, f"mismatch vs reference: max abs err {err}"

    # Ragged row count exercises the padding path.
    x2 = jax.random.normal(kr, (3, 5, d_in), dtype=jnp.float32)
    out2 = jax.block_until_ready(projection_forward(x2, params))
    ref2 = _reference_forward(x2, w1, w2, gamma, beta)
    assert out2.shape == (3, 5, d_out)
    err2 = float(jnp.max(jnp.abs(out2 - ref2)))
    assert err2 < 5e-2, f"mismatch vs reference (ragged): max abs err {err2}"

    # Lane-aligned shapes exercise the no-copy fast path, non-trivial LN affine
    # params, and a >= 2-step row grid.
    d3 = 128
    x3 = jax.random.normal(kx3, (2, 64, d3), dtype=jnp.float32)
    b3 = 1.0 / math.sqrt(d3)
    w13 = jax.random.uniform(k13, (d3, d3), jnp.float32, -b3, b3)
    w23 = jax.random.uniform(k23, (d3, d3), jnp.float32, -b3, b3)
    gamma3 = 1.0 + 0.1 * jax.random.uniform(kg3, (d3,), jnp.float32)
    beta3 = 0.1 * jax.random.normal(kb3, (d3,), jnp.float32)
    params3 = prepare_projection_params(w13, w23, gamma3, beta3)
    out3 = jax.block_until_ready(projection_forward(x3, params3))
    ref3 = _reference_forward(x3, w13, w23, gamma3, beta3)
    assert out3.shape == (2, 64, d3)
    err3 = float(jnp.max(jnp.abs(out3 - ref3)))
    assert err3 < 5e-2, f"mismatch vs reference (fast path): max abs err {err3}"

    print("KERNEL_OK")
</pallas_src>

<mosaic_0001>
module attributes {stable_mosaic.version = 11 : i64} {
  func.func @_projection_kernel(%arg0: i32, %arg1: memref<16x128xbf16, #tpu.memory_space<vmem>>, %arg2: memref<128x128xbf16, #tpu.memory_space<vmem>>, %arg3: memref<128x128xbf16, #tpu.memory_space<vmem>>, %arg4: memref<1x128xf32, #tpu.memory_space<vmem>>, %arg5: memref<1x128xf32, #tpu.memory_space<vmem>>, %arg6: memref<16x128xf32, #tpu.memory_space<vmem>>) attributes {dimension_semantics = [#tpu.dimension_semantics<parallel>], iteration_bounds = array<i64: 1>, scalar_prefetch = 0 : i64, scratch_operands = 0 : i64, tpu.core_type = #tpu.core_type<tc>, window_params = [{transform_indices = @transform_0, window_bounds = array<i64: 16, 128>}, {pipeline_mode = #tpu.pipeline_mode<synchronous>, transform_indices = @transform_1, window_bounds = array<i64: 128, 128>}, {pipeline_mode = #tpu.pipeline_mode<synchronous>, transform_indices = @transform_2, window_bounds = array<i64: 128, 128>}, {pipeline_mode = #tpu.pipeline_mode<synchronous>, transform_indices = @transform_3, window_bounds = array<i64: 1, 128>}, {pipeline_mode = #tpu.pipeline_mode<synchronous>, transform_indices = @transform_4, window_bounds = array<i64: 1, 128>}, {transform_indices = @transform_5, window_bounds = array<i64: 16, 128>}]} {
    %c0 = arith.constant 0 : index
    %c0_0 = arith.constant 0 : index
    %0 = vector.load %arg1[%c0, %c0_0] : memref<16x128xbf16, #tpu.memory_space<vmem>>, vector<16x128xbf16>
    %c0_1 = arith.constant 0 : index
    %c0_2 = arith.constant 0 : index
    %1 = vector.load %arg2[%c0_1, %c0_2] : memref<128x128xbf16, #tpu.memory_space<vmem>>, vector<128x128xbf16>
    %cst = arith.constant dense<0.000000e+00> : vector<16x128xf32>
    %2 = tpu.matmul %0, %1, %cst {dimension_numbers = #tpu.dot_dimension_numbers<[1], [0], [0], [1], [0, 0, 1, 1], [], []>} : vector<16x128xbf16>, vector<128x128xbf16>, vector<16x128xf32> -> vector<16x128xf32>
    %cst_3 = arith.constant 5.000000e-01 : f32
    %3 = vector.broadcast %cst_3 : f32 to vector<16x128xf32>
    %4 = arith.mulf %3, %2 : vector<16x128xf32>
    %cst_4 = arith.constant 0.707106769 : f32
    %5 = vector.broadcast %cst_4 : f32 to vector<16x128xf32>
    %6 = arith.mulf %2, %5 : vector<16x128xf32>
    %7 = math.erf %6 : vector<16x128xf32>
    %cst_5 = arith.constant 1.000000e+00 : f32
    %8 = vector.broadcast %cst_5 : f32 to vector<16x128xf32>
    %9 = arith.addf %8, %7 : vector<16x128xf32>
    %10 = arith.mulf %4, %9 : vector<16x128xf32>
    %11 = arith.truncf %10 : vector<16x128xf32> to vector<16x128xbf16>
    %c0_6 = arith.constant 0 : index
    %c0_7 = arith.constant 0 : index
    %12 = vector.load %arg3[%c0_6, %c0_7] : memref<128x128xbf16, #tpu.memory_space<vmem>>, vector<128x128xbf16>
    %cst_8 = arith.constant dense<0.000000e+00> : vector<16x128xf32>
    %13 = tpu.matmul %11, %12, %cst_8 {dimension_numbers = #tpu.dot_dimension_numbers<[1], [0], [0], [1], [0, 0, 1, 1], [], []>} : vector<16x128xbf16>, vector<128x128xbf16>, vector<16x128xf32> -> vector<16x128xf32>
    %14 = arith.addf %2, %13 : vector<16x128xf32>
    %cst_9 = arith.constant dense<0.000000e+00> : vector<16xf32>
    %15 = vector.multi_reduction <add>, %14, %cst_9 [1] : vector<16x128xf32> to vector<16xf32>
    %16 = vector.shape_cast %15 : vector<16xf32> to vector<16x1xf32>
    %cst_10 = arith.constant 3.125000e-02 : f32
    %17 = vector.broadcast %cst_10 : f32 to vector<16x1xf32>
    %18 = arith.mulf %16, %17 : vector<16x1xf32>
    %19 = arith.mulf %14, %14 : vector<16x128xf32>
    %cst_11 = arith.constant dense<0.000000e+00> : vector<16xf32>
    %20 = vector.multi_reduction <add>, %19, %cst_11 [1] : vector<16x128xf32> to vector<16xf32>
    %21 = vector.shape_cast %20 : vector<16xf32> to vector<16x1xf32>
    %cst_12 = arith.constant 3.125000e-02 : f32
    %22 = vector.broadcast %cst_12 : f32 to vector<16x1xf32>
    %23 = arith.mulf %21, %22 : vector<16x1xf32>
    %24 = arith.mulf %18, %18 : vector<16x1xf32>
    %25 = arith.subf %23, %24 : vector<16x1xf32>
    %cst_13 = arith.constant 0.000000e+00 : f32
    %26 = vector.broadcast %cst_13 : f32 to vector<16x1xf32>
    %27 = arith.maximumf %25, %26 : vector<16x1xf32>
    %28 = vector.broadcast %18 : vector<16x1xf32> to vector<16x128xf32>
    %29 = arith.subf %14, %28 : vector<16x128xf32>
    %cst_14 = arith.constant 9.99999974E-6 : f32
    %30 = vector.broadcast %cst_14 : f32 to vector<16x1xf32>
    %31 = arith.addf %27, %30 : vector<16x1xf32>
    %32 = math.rsqrt %31 : vector<16x1xf32>
    %33 = vector.broadcast %32 : vector<16x1xf32> to vector<16x128xf32>
    %34 = arith.mulf %29, %33 : vector<16x128xf32>
    %c0_15 = arith.constant 0 : index
    %c0_16 = arith.constant 0 : index
    %35 = vector.load %arg4[%c0_15, %c0_16] : memref<1x128xf32, #tpu.memory_space<vmem>>, vector<1x128xf32>
    %36 = vector.broadcast %35 : vector<1x128xf32> to vector<16x128xf32>
    %37 = arith.mulf %34, %36 : vector<16x128xf32>
    %c0_17 = arith.constant 0 : index
    %c0_18 = arith.constant 0 : index
    %38 = vector.load %arg5[%c0_17, %c0_18] : memref<1x128xf32, #tpu.memory_space<vmem>>, vector<1x128xf32>
    %39 = vector.broadcast %38 : vector<1x128xf32> to vector<16x128xf32>
    %40 = arith.addf %37, %39 : vector<16x128xf32>
    %c0_19 = arith.constant 0 : index
    %c0_20 = arith.constant 0 : index
    %41 = vector.load %arg6[%c0_19, %c0_20] : memref<16x128xf32, #tpu.memory_space<vmem>>, vector<16x128xf32>
    tpu.vector_store %arg6[%c0_19, %c0_20], %40 {strides = array<i32>} : memref<16x128xf32, #tpu.memory_space<vmem>>, vector<16x128xf32>,
    return
  }
  func.func @transform_0(%arg0: i32) -> (i32, i32) {
    %c0_i32 = arith.constant 0 : i32
    %c0_i32_0 = arith.constant 0 : i32
    return %arg0, %c0_i32 : i32, i32
  }
  func.func @transform_1(%arg0: i32) -> (i32, i32) {
    %c0_i32 = arith.constant 0 : i32
    %c0_i32_0 = arith.constant 0 : i32
    %c0_i32_1 = arith.constant 0 : i32
    return %c0_i32, %c0_i32_0 : i32, i32
  }
  func.func @transform_2(%arg0: i32) -> (i32, i32) {
    %c0_i32 = arith.constant 0 : i32
    %c0_i32_0 = arith.constant 0 : i32
    %c0_i32_1 = arith.constant 0 : i32
    return %c0_i32, %c0_i32_0 : i32, i32
  }
  func.func @transform_3(%arg0: i32) -> (i32, i32) {
    %c0_i32 = arith.constant 0 : i32
    %c0_i32_0 = arith.constant 0 : i32
    %c0_i32_1 = arith.constant 0 : i32
    return %c0_i32, %c0_i32_0 : i32, i32
  }
  func.func @transform_4(%arg0: i32) -> (i32, i32) {
    %c0_i32 = arith.constant 0 : i32
    %c0_i32_0 = arith.constant 0 : i32
    %c0_i32_1 = arith.constant 0 : i32
    return %c0_i32, %c0_i32_0 : i32, i32
  }
  func.func @transform_5(%arg0: i32) -> (i32, i32) {
    %c0_i32 = arith.constant 0 : i32
    %c0_i32_0 = arith.constant 0 : i32
    return %arg0, %c0_i32 : i32, i32
  }
}

module attributes {stable_mosaic.version = 11 : i64} {
  func.func @_projection_kernel(%arg0: i32, %arg1: memref<16x128xbf16, #tpu.memory_space<vmem>>, %arg2: memref<128x128xbf16, #tpu.memory_space<vmem>>, %arg3: memref<128x128xbf16, #tpu.memory_space<vmem>>, %arg4: memref<1x128xf32, #tpu.memory_space<vmem>>, %arg5: memref<1x128xf32, #tpu.memory_space<vmem>>, %arg6: memref<16x128xf32, #tpu.memory_space<vmem>>) attributes {dimension_semantics = [#tpu.dimension_semantics<parallel>], iteration_bounds = array<i64: 1>, scalar_prefetch = 0 : i64, scratch_operands = 0 : i64, tpu.core_type = #tpu.core_type<tc>, window_params = [{transform_indices = @transform_0, window_bounds = array<i64: 16, 128>}, {pipeline_mode = #tpu.pipeline_mode<synchronous>, transform_indices = @transform_1, window_bounds = array<i64: 128, 128>}, {pipeline_mode = #tpu.pipeline_mode<synchronous>, transform_indices = @transform_2, window_bounds = array<i64: 128, 128>}, {pipeline_mode = #tpu.pipeline_mode<synchronous>, transform_indices = @transform_3, window_bounds = array<i64: 1, 128>}, {pipeline_mode = #tpu.pipeline_mode<synchronous>, transform_indices = @transform_4, window_bounds = array<i64: 1, 128>}, {transform_indices = @transform_5, window_bounds = array<i64: 16, 128>}]} {
    %c0 = arith.constant 0 : index
    %c0_0 = arith.constant 0 : index
    %0 = vector.load %arg1[%c0, %c0_0] : memref<16x128xbf16, #tpu.memory_space<vmem>>, vector<16x128xbf16>
    %c0_1 = arith.constant 0 : index
    %c0_2 = arith.constant 0 : index
    %1 = vector.load %arg2[%c0_1, %c0_2] : memref<128x128xbf16, #tpu.memory_space<vmem>>, vector<128x128xbf16>
    %cst = arith.constant dense<0.000000e+00> : vector<16x128xf32>
    %2 = tpu.matmul %0, %1, %cst {dimension_numbers = #tpu.dot_dimension_numbers<[1], [0], [0], [1], [0, 0, 1, 1], [], []>} : vector<16x128xbf16>, vector<128x128xbf16>, vector<16x128xf32> -> vector<16x128xf32>
    %cst_3 = arith.constant 5.000000e-01 : f32
    %3 = vector.broadcast %cst_3 : f32 to vector<16x128xf32>
    %4 = arith.mulf %3, %2 : vector<16x128xf32>
    %cst_4 = arith.constant 0.707106769 : f32
    %5 = vector.broadcast %cst_4 : f32 to vector<16x128xf32>
    %6 = arith.mulf %2, %5 : vector<16x128xf32>
    %7 = math.erf %6 : vector<16x128xf32>
    %cst_5 = arith.constant 1.000000e+00 : f32
    %8 = vector.broadcast %cst_5 : f32 to vector<16x128xf32>
    %9 = arith.addf %8, %7 : vector<16x128xf32>
    %10 = arith.mulf %4, %9 : vector<16x128xf32>
    %11 = arith.truncf %10 : vector<16x128xf32> to vector<16x128xbf16>
    %c0_6 = arith.constant 0 : index
    %c0_7 = arith.constant 0 : index
    %12 = vector.load %arg3[%c0_6, %c0_7] : memref<128x128xbf16, #tpu.memory_space<vmem>>, vector<128x128xbf16>
    %cst_8 = arith.constant dense<0.000000e+00> : vector<16x128xf32>
    %13 = tpu.matmul %11, %12, %cst_8 {dimension_numbers = #tpu.dot_dimension_numbers<[1], [0], [0], [1], [0, 0, 1, 1], [], []>} : vector<16x128xbf16>, vector<128x128xbf16>, vector<16x128xf32> -> vector<16x128xf32>
    %14 = arith.addf %2, %13 : vector<16x128xf32>
    %cst_9 = arith.constant dense<0.000000e+00> : vector<16xf32>
    %15 = vector.multi_reduction <add>, %14, %cst_9 [1] : vector<16x128xf32> to vector<16xf32>
    %16 = vector.shape_cast %15 : vector<16xf32> to vector<16x1xf32>
    %cst_10 = arith.constant 3.125000e-02 : f32
    %17 = vector.broadcast %cst_10 : f32 to vector<16x1xf32>
    %18 = arith.mulf %16, %17 : vector<16x1xf32>
    %19 = arith.mulf %14, %14 : vector<16x128xf32>
    %cst_11 = arith.constant dense<0.000000e+00> : vector<16xf32>
    %20 = vector.multi_reduction <add>, %19, %cst_11 [1] : vector<16x128xf32> to vector<16xf32>
    %21 = vector.shape_cast %20 : vector<16xf32> to vector<16x1xf32>
    %cst_12 = arith.constant 3.125000e-02 : f32
    %22 = vector.broadcast %cst_12 : f32 to vector<16x1xf32>
    %23 = arith.mulf %21, %22 : vector<16x1xf32>
    %24 = arith.mulf %18, %18 : vector<16x1xf32>
    %25 = arith.subf %23, %24 : vector<16x1xf32>
    %cst_13 = arith.constant 0.000000e+00 : f32
    %26 = vector.broadcast %cst_13 : f32 to vector<16x1xf32>
    %27 = arith.maximumf %25, %26 : vector<16x1xf32>
    %28 = vector.broadcast %18 : vector<16x1xf32> to vector<16x128xf32>
    %29 = arith.subf %14, %28 : vector<16x128xf32>
    %cst_14 = arith.constant 9.99999974E-6 : f32
    %30 = vector.broadcast %cst_14 : f32 to vector<16x1xf32>
    %31 = arith.addf %27, %30 : vector<16x1xf32>
    %32 = math.rsqrt %31 : vector<16x1xf32>
    %33 = vector.broadcast %32 : vector<16x1xf32> to vector<16x128xf32>
    %34 = arith.mulf %29, %33 : vector<16x128xf32>
    %c0_15 = arith.constant 0 : index
    %c0_16 = arith.constant 0 : index
    %35 = vector.load %arg4[%c0_15, %c0_16] : memref<1x128xf32, #tpu.memory_space<vmem>>, vector<1x128xf32>
    %36 = vector.broadcast %35 : vector<1x128xf32> to vector<16x128xf32>
    %37 = arith.mulf %34, %36 : vector<16x128xf32>
    %c0_17 = arith.constant 0 : index
    %c0_18 = arith.constant 0 : index
    %38 = vector.load %arg5[%c0_17, %c0_18] : memref<1x128xf32, #tpu.memory_space<vmem>>, vector<1x128xf32>
    %39 = vector.broadcast %38 : vector<1x128xf32> to vector<16x128xf32>
    %40 = arith.addf %37, %39 : vector<16x128xf32>
    %c0_19 = arith.constant 0 : index
    %c0_20 = arith.constant 0 : index
    %41 = vector.load %arg6[%c0_19, %c0_20] : memref<16x128xf32, #tpu.memory_space<vmem>>, vector<16x128xf32>
    tpu.vector_store %arg6[%c0_19, %c0_20], %40 {strides = array<i32>} : memref<16x128xf32, #tpu.memory_space<vmem>>, vector<16x128xf32>,
    return
  }
  func.func @transform_0(%arg0: i32) -> (i32, i32) {
    %c0_i32 = arith.constant 0 : i32
    %c0_i32_0 = arith.constant 0 : i32
    return %arg0, %c0_i32 : i32, i32
  }
  func.func @transform_1(%arg0: i32) -> (i32, i32) {
    %c0_i32 = arith.constant 0 : i32
    %c0_i32_0 = arith.constant 0 : i32
    %c0_i32_1 = arith.constant 0 : i32
    return %c0_i32, %c0_i32_0 : i32, i32
  }
  func.func @transform_2(%arg0: i32) -> (i32, i32) {
    %c0_i32 = arith.constant 0 : i32
    %c0_i32_0 = arith.constant 0 : i32
    %c0_i32_1 = arith.constant 0 : i32
    return %c0_i32, %c0_i32_0 : i32, i32
  }
  func.func @transform_3(%arg0: i32) -> (i32, i32) {
    %c0_i32 = arith.constant 0 : i32
    %c0_i32_0 = arith.constant 0 : i32
    %c0_i32_1 = arith.constant 0 : i32
    return %c0_i32, %c0_i32_0 : i32, i32
  }
  func.func @transform_4(%arg0: i32) -> (i32, i32) {
    %c0_i32 = arith.constant 0 : i32
    %c0_i32_0 = arith.constant 0 : i32
    %c0_i32_1 = arith.constant 0 : i32
    return %c0_i32, %c0_i32_0 : i32, i32
  }
  func.func @transform_5(%arg0: i32) -> (i32, i32) {
    %c0_i32 = arith.constant 0 : i32
    %c0_i32_0 = arith.constant 0 : i32
    return %arg0, %c0_i32 : i32, i32
  }
}

</mosaic_0001>

<bundles_post_ra>
// kernel: tpu_custom_call.1
= control target key start
LH: loop header
LB: loop body
LE: loop exit
PB: predicated region body
PF: predicated region fallthrough
CT: control target
= control target key end

     0   :  { %10 = vsyncpa [#allocation3], 0  ;;  %s616_s0 = inlined_call_operand.hbm [shape: bf16[16,128], index: 0, kind: input, shape index: {}]   ;;  %s617_s1 = inlined_call_operand.hbm [shape: bf16[128,128], index: 1, kind: input, shape index: {}]   ;;  %s618_s2 = inlined_call_operand.hbm [shape: bf16[128,128], index: 2, kind: input, shape index: {}]   ;;  %s619_s3 = inlined_call_operand.vmem [shape: f32[1,128], index: 3, kind: input, shape index: {}]   ;;  %s620_s4 = inlined_call_operand.vmem [shape: f32[1,128], index: 4, kind: input, shape index: {}]   ;;  %s621_s5 = inlined_call_operand.hbm [shape: f32[16,128], index: 5, kind: output, shape index: {}]  }
   0x1   :  { %11 = vsyncpa [#allocation6], 0 }
   0x2   :  { %12 = vsyncpa [#allocation4], 0  ;;  %s558_s18 = smov [#allocation5]   ;;  %s559_s20 = smov [#allocation2]  }
   0x3   :  { %s30_s19 = sshll.u32 %s558_s18, 4  ;;  %s18_s21 = sshll.u32 %s559_s20, 4  ;;  %s31_s19 = int_to_ptr.vmem [resolvable:$true] %s30_s19  ;;  %s19_s21 = int_to_ptr.vmem [resolvable:$true] %s18_s21 }
   0x4   :  { %s480_s22 = scalar_lea.vmem %s31_s19, 1024  ;;  %p485_p1 = scmp.lt.s32.totalorder %s31_s19, %s31_s19 }
   0x5   :  { %p481_p0 = scmp.ne.s32.totalorder %s31_s19, %s480_s22  ;;  %p486_p2 = scmp.lt.s32.totalorder %s480_s22, %s480_s22 }
   0x7   :  { %p487_p3 = por %p486_p2, %p485_p1 }
   0x9   :  { %p488_p4 = pnand %p487_p3, %p481_p0 }
   0xb   :  { %491 = shalt.err (!%p488_p4)
}
   0xc   :  { %s560_s23 = smov 64   ;;  %s561_s24 = smov 4  }
   0xd   :  { %36 = dma.hbm_to_vmem [thread:$0]  %s617_s1, 1024, %s31_s19, [#allocation6], %s560_s23, %s560_s23, %s561_s24  }
   0xe   :  { %s500_s27 = scalar_lea.vmem %s19_s21, 128  ;;  %p505_p6 = scmp.lt.s32.totalorder %s19_s21, %s19_s21 }
   0xf   :  { %p501_p5 = scmp.ne.s32.totalorder %s19_s21, %s500_s27  ;;  %p506_p7 = scmp.lt.s32.totalorder %s500_s27, %s500_s27 }
  0x11   :  { %p507_p8 = por %p506_p7, %p505_p6 }
  0x13   :  { %p508_p9 = pnand %p507_p8, %p501_p5 }
  0x15   :  { %511 = shalt.err (!%p508_p9)
}
  0x16   :  { %24 = dma.hbm_to_vmem [thread:$0]  %s616_s0, 128, %s19_s21, [#allocation3], %s560_s23, %s560_s23, %s561_s24  }
  0x17   :  { %s562_s30 = smov [#allocation7]  }
  0x18   :  { %s42_s6 = sshll.u32 %s562_s30, 4  ;;  %s43_s6 = int_to_ptr.vmem [resolvable:$true] %s42_s6 }
  0x19   :  { %s520_s7 = scalar_lea.vmem %s43_s6, 1024  ;;  %p525_p11 = scmp.lt.s32.totalorder %s43_s6, %s43_s6 }
  0x1a   :  { %p521_p10 = scmp.ne.s32.totalorder %s43_s6, %s520_s7  ;;  %p526_p12 = scmp.lt.s32.totalorder %s520_s7, %s520_s7 }
  0x1c   :  { %p527_p13 = por %p526_p12, %p525_p11 }
  0x1e   :  { %p528_p0 = pnand %p527_p13, %p521_p10 }
  0x20   :  { %531 = shalt.err (!%p528_p0)
}
  0x21   :  { %48 = dma.hbm_to_vmem [thread:$0]  %s618_s2, 1024, %s43_s6, [#allocation6], %s560_s23, %s560_s23, %s561_s24  }
  0x22   :  { %552 = dma.done.wait [#allocation3], 128  }
  0x23   :  { %553 = vsyncadd [#allocation3], 4294967168 }
  0x24   :  { %554 = dma.done.wait [#allocation6], 2048  }
  0x25   :  { %555 = vsyncadd [#allocation6], 4294965248  ;;  %v563_v0 = vmov 0.0   ;;  %vm564_vm0 = vmmov 0   ;;  %v447_v1 = vld [vmem:[#allocation5 + $0x38] sm:$0xff]   ;;  %v448_v2 = vld [vmem:[#allocation5 + $0x30] sm:$0xff]  }
  0x26   :  { %397 = vmatprep.subr.bf16.mxu0 %v563_v0  ;;  %413 = vmatprep.mubr.msk.bf16.mxu0 %vm564_vm0, %v563_v0  ;;  %v449_v3 = vld [vmem:[#allocation5 + $0x28] sm:$0xff]   ;;  %v450_v4 = vld [vmem:[#allocation5 + $0x20] sm:$0xff]   ;;  %v456_v5 = vld [vmem:[#allocation7 + $0x38] sm:$0xff]   ;;  %s565_s11 = smov [#allocation8]  }
  0x27   :  { %417 = vmatprep.subr.bf16.mxu1 %v563_v0  ;;  %433 = vmatprep.mubr.msk.bf16.mxu1 %vm564_vm0, %v563_v0  ;;  %v451_v6 = vld [vmem:[#allocation5 + $0x18] sm:$0xff]   ;;  %v452_v7 = vld [vmem:[#allocation5 + $0x10] sm:$0xff]   ;;  %v453_v8 = vld [vmem:[#allocation5 + $0x8] sm:$0xff]   ;;  %s347_s12 = sshll.u32 %s565_s11, 4  ;;  %s348_s12 = int_to_ptr.vmem [resolvable:$true] %s347_s12 }
  0x28   :  { %398 = vmatpush3.bf16.msra.mxu0 %v447_v1  ;;  %418 = vmatpush3.bf16.msra.mxu1 %v456_v5  ;;  %v454_v9 = vld [vmem:[#allocation5] sm:$0xff]   ;;  %v455_v10 = vld [vmem:[#allocation2] sm:$0xff]   ;;  %v457_v11 = vld [vmem:[#allocation7 + $0x30] sm:$0xff]   ;;  %s532_s13 = scalar_lea.vmem %s348_s12, 256  ;;  %p537_p2 = scmp.lt.s32.totalorder %s348_s12, %s348_s12 }
  0x29   :  { %399 = vmatprep.subr.bf16.mxu0 %v563_v0  ;;  %419 = vmatprep.subr.bf16.mxu1 %v563_v0  ;;  %v458_v12 = vld [vmem:[#allocation7 + $0x28] sm:$0xff]   ;;  %v459_v13 = vld [vmem:[#allocation7 + $0x20] sm:$0xff]   ;;  %v460_v14 = vld [vmem:[#allocation7 + $0x18] sm:$0xff]   ;;  %p533_p1 = scmp.ne.s32.totalorder %s348_s12, %s532_s13  ;;  %p538_p3 = scmp.lt.s32.totalorder %s532_s13, %s532_s13 }
  0x2a   :  { %v461_v15 = vld [vmem:[#allocation7 + $0x10] sm:$0xff]   ;;  %v462_v16 = vld [vmem:[#allocation7 + $0x8] sm:$0xff]   ;;  %v463_v17 = vld [vmem:[#allocation7] sm:$0xff]  }
  0x2b   :  { %v377_v59 = vld [vmem:[%s619_s3] ss:$0 sm:$0xff]  ;;  %p539_p4 = por %p538_p3, %p537_p2 }
  0x2c   :  { %400 = vmatpush3.bf16.msra.mxu0 %v448_v2  ;;  %420 = vmatpush3.bf16.msra.mxu1 %v457_v11  ;;  %v378_v61 = vld [vmem:[%s620_s4] ss:$0 sm:$0xff] }
  0x2d   :  { %401 = vmatprep.subr.bf16.mxu0 %v563_v0  ;;  %421 = vmatprep.subr.bf16.mxu1 %v563_v0  ;;  %p540_p5 = pnand %p539_p4, %p533_p1 }
  0x30   :  { %402 = vmatpush3.bf16.msra.mxu0 %v449_v3  ;;  %422 = vmatpush3.bf16.msra.mxu1 %v458_v12 }
  0x31   :  { %403 = vmatprep.subr.bf16.mxu0 %v563_v0  ;;  %423 = vmatprep.subr.bf16.mxu1 %v563_v0 }
  0x34   :  { %404 = vmatpush3.bf16.msra.mxu0 %v450_v4  ;;  %424 = vmatpush3.bf16.msra.mxu1 %v459_v13 }
  0x35   :  { %405 = vmatprep.subr.bf16.mxu0 %v563_v0  ;;  %425 = vmatprep.subr.bf16.mxu1 %v563_v0 }
  0x38   :  { %406 = vmatpush3.bf16.msra.mxu0 %v451_v6  ;;  %426 = vmatpush3.bf16.msra.mxu1 %v460_v14 }
  0x39   :  { %407 = vmatprep.subr.bf16.mxu0 %v563_v0  ;;  %427 = vmatprep.subr.bf16.mxu1 %v563_v0 }
  0x3c   :  { %408 = vmatpush3.bf16.msra.mxu0 %v452_v7  ;;  %428 = vmatpush3.bf16.msra.mxu1 %v461_v15 }
  0x3d   :  { %409 = vmatprep.subr.bf16.mxu0 %v563_v0  ;;  %429 = vmatprep.subr.bf16.mxu1 %v563_v0 }
  0x40   :  { %410 = vmatpush3.bf16.msra.mxu0 %v453_v8  ;;  %430 = vmatpush3.bf16.msra.mxu1 %v462_v16 }
  0x41   :  { %411 = vmatprep.subr.bf16.mxu0 %v563_v0  ;;  %431 = vmatprep.subr.bf16.mxu1 %v563_v0 }
  0x44   :  { %412 = vmatpush3.bf16.msra.mxu0 %v454_v9  ;;  %432 = vmatpush3.bf16.msra.mxu1 %v463_v17 }
  0x47   :  { %414 = vmatmul.mubr.bf16.vlgmr.msra.gmra.mxu0 %v455_v10 }
 0x107   :  { %v169_v18 = vpop.f32.mrf.mxu0 }
 0x108   :  { %v178_v19 = vmul.f32 0.70710677, %v169_v18  ;;  %v176_v27 = vmul.f32 0.5, %v169_v18 }
 0x109   :  { %v415_v20 = vpop.f32.mrf.mxu0 }
 0x10a   :  { %464 = verf.f32 %v178_v19 }
 0x10b   :  { %v172_v21 = vpop.f32.mrf.mxu0 }
 0x10c   :  { %v179_v22 = vmul.f32 0.70710677, %v172_v21  ;;  %v177_v28 = vmul.f32 0.5, %v172_v21 }
 0x10d   :  { %v416_v23 = vpop.f32.mrf.mxu0 }
 0x10e   :  { %466 = verf.f32 %v179_v22 }
 0x117   :  { %v465_v24 = vpop.eup %464 }
 0x118   :  { %v182_v25 = vadd.f32 1.0, %v465_v24 }
 0x11a   :  { %v184_v30 = vmul.f32 %v182_v25, %v176_v27 }
 0x11b   :  { %v467_v26 = vpop.eup %466 }
 0x11c   :  { %v183_v29 = vadd.f32 1.0, %v467_v26 }
 0x11e   :  { %v185_v31 = vmul.f32 %v183_v29, %v177_v28 }
 0x120   :  { %v186_v32 = vpack.c.bf16 %v185_v31, %v184_v30 }
 0x122   :  { %434 = vmatmul.mubr.bf16.vlgmr.msra.gmra.mxu1 %v186_v32 }
 0x1e2   :  { %v285_v33 = vpop.f32.mrf.mxu1 }
 0x1e3   :  { %v292_v34 = vadd.f32 %v285_v33, %v169_v18 }
 0x1e4   :  { %v435_v35 = vpop.f32.mrf.mxu1 }
 0x1e5   :  { %294 = vadd.xlane.f32.xlu0 %v292_v34  ;;  %v300_v36 = vmul.f32 %v292_v34, %v292_v34 }
 0x1e6   :  { %v288_v37 = vpop.f32.mrf.mxu1 }
 0x1e7   :  { %v293_v38 = vadd.f32 %v288_v37, %v172_v21  ;;  %302 = vadd.xlane.f32.xlu1 %v300_v36 }
 0x1e8   :  { %v436_v39 = vpop.f32.mrf.mxu1 }
 0x1e9   :  { %296 = vadd.xlane.f32.xlu0 %v293_v38  ;;  %v301_v40 = vmul.f32 %v293_v38, %v293_v38 }
 0x1eb   :  { %304 = vadd.xlane.f32.xlu1 %v301_v40 }
 0x26e   :  { %v295_v41 = vpop.xlane.xlu0 %294 }
 0x26f   :  { %v298_v42 = vmul.f32 0.03125, %v295_v41 }
 0x270   :  { %v303_v43 = vpop.xlane.xlu1 %302 }
 0x271   :  { %v308_v44 = vmul.f32 %v298_v42, %v298_v42  ;;  %v306_v45 = vmul.f32 0.03125, %v303_v43  ;;  %v314_v57 = vsub.f32 %v292_v34, %v298_v42 }
 0x272   :  { %v297_v46 = vpop.xlane.xlu0 %296 }
 0x273   :  { %v310_v47 = vsub.f32 %v306_v45, %v308_v44  ;;  %v299_v48 = vmul.f32 0.03125, %v297_v46 }
 0x274   :  { %v305_v49 = vpop.xlane.xlu1 %304 }
 0x275   :  { %v312_v50 = vmax.f32 %v310_v47, 0.0  ;;  %v309_v51 = vmul.f32 %v299_v48, %v299_v48  ;;  %v307_v52 = vmul.f32 0.03125, %v305_v49  ;;  %v315_v62 = vsub.f32 %v293_v38, %v299_v48 }
 0x277   :  { %v316_v53 = vadd.f32 1e-05, %v312_v50  ;;  %v311_v54 = vsub.f32 %v307_v52, %v309_v51 }
 0x279   :  { %468 = vrsqrt.f32 %v316_v53  ;;  %v313_v55 = vmax.f32 %v311_v54, 0.0 }
 0x27b   :  { %v317_v56 = vadd.f32 1e-05, %v313_v55 }
 0x27d   :  { %470 = vrsqrt.f32 %v317_v56 }
 0x286   :  { %v469_v58 = vpop.eup %468 }
 0x287   :  { %v320_v60 = vmul.f32 %v469_v58, %v314_v57 }
 0x289   :  { %v329_v63 = vmul.f32 %v377_v59, %v320_v60 }
 0x28a   :  { %v471_v0 = vpop.eup %470 }
 0x28b   :  { %v321_v1 = vmul.f32 %v471_v0, %v315_v62  ;;  %v338_v2 = vadd.f32 %v378_v61, %v329_v63 }
 0x28d   :  { %v330_v3 = vmul.f32 %v377_v59, %v321_v1  ;;  %340 = vst [vmem:[#allocation8] sm:$0xff] %v338_v2 }
 0x28f   :  { %v339_v4 = vadd.f32 %v378_v61, %v330_v3 }
 0x291   :  { %341 = vst [vmem:[#allocation8 + $0x8] sm:$0xff] %v339_v4 }
 0x292   :  { %543 = shalt.err (!%p540_p5)
}
 0x293   :  { %s566_s3 = smov 128   ;;  %s567_s4 = smov 8  }
 0x294   :  { %353 = dma.vmem_to_hbm [thread:$0]  %s348_s12, 256, %s621_s5, [#allocation4], %s566_s3, %s566_s3, %s567_s4  }
 0x295   :  { %556 = dma.done.wait [#allocation4], 256  }
 0x296   :  { %557 = vsyncadd [#allocation4], 4294967040 }
 0x297   :  { %357 = vsyncpa [#allocation3], 1 }
 0x298   :  { %358 = vsyncpa [#allocation6], 1 }
 0x299   :  { %359 = vsyncpa [#allocation4], 1 }

// kernel: tpu_custom_call.1
= control target key start
LH: loop header
LB: loop body
LE: loop exit
PB: predicated region body
PF: predicated region fallthrough
CT: control target
= control target key end

     0   :  { %10 = vsyncpa [#allocation3], 0  ;;  %s616_s0 = inlined_call_operand.hbm [shape: bf16[16,128], index: 0, kind: input, shape index: {}]   ;;  %s617_s1 = inlined_call_operand.hbm [shape: bf16[128,128], index: 1, kind: input, shape index: {}]   ;;  %s618_s2 = inlined_call_operand.hbm [shape: bf16[128,128], index: 2, kind: input, shape index: {}]   ;;  %s619_s3 = inlined_call_operand.vmem [shape: f32[1,128], index: 3, kind: input, shape index: {}]   ;;  %s620_s4 = inlined_call_operand.vmem [shape: f32[1,128], index: 4, kind: input, shape index: {}]   ;;  %s621_s5 = inlined_call_operand.hbm [shape: f32[16,128], index: 5, kind: output, shape index: {}]  }
   0x1   :  { %11 = vsyncpa [#allocation6], 0 }
   0x2   :  { %12 = vsyncpa [#allocation4], 0  ;;  %s558_s18 = smov [#allocation5]   ;;  %s559_s20 = smov [#allocation2]  }
   0x3   :  { %s30_s19 = sshll.u32 %s558_s18, 4  ;;  %s18_s21 = sshll.u32 %s559_s20, 4  ;;  %s31_s19 = int_to_ptr.vmem [resolvable:$true] %s30_s19  ;;  %s19_s21 = int_to_ptr.vmem [resolvable:$true] %s18_s21 }
   0x4   :  { %s480_s22 = scalar_lea.vmem %s31_s19, 1024  ;;  %p485_p1 = scmp.lt.s32.totalorder %s31_s19, %s31_s19 }
   0x5   :  { %p481_p0 = scmp.ne.s32.totalorder %s31_s19, %s480_s22  ;;  %p486_p2 = scmp.lt.s32.totalorder %s480_s22, %s480_s22 }
   0x7   :  { %p487_p3 = por %p486_p2, %p485_p1 }
   0x9   :  { %p488_p4 = pnand %p487_p3, %p481_p0 }
   0xb   :  { %491 = shalt.err (!%p488_p4)
}
   0xc   :  { %s560_s23 = smov 64   ;;  %s561_s24 = smov 4  }
   0xd   :  { %36 = dma.hbm_to_vmem [thread:$0]  %s617_s1, 1024, %s31_s19, [#allocation6], %s560_s23, %s560_s23, %s561_s24  }
   0xe   :  { %s500_s27 = scalar_lea.vmem %s19_s21, 128  ;;  %p505_p6 = scmp.lt.s32.totalorder %s19_s21, %s19_s21 }
   0xf   :  { %p501_p5 = scmp.ne.s32.totalorder %s19_s21, %s500_s27  ;;  %p506_p7 = scmp.lt.s32.totalorder %s500_s27, %s500_s27 }
  0x11   :  { %p507_p8 = por %p506_p7, %p505_p6 }
  0x13   :  { %p508_p9 = pnand %p507_p8, %p501_p5 }
  0x15   :  { %511 = shalt.err (!%p508_p9)
}
  0x16   :  { %24 = dma.hbm_to_vmem [thread:$0]  %s616_s0, 128, %s19_s21, [#allocation3], %s560_s23, %s560_s23, %s561_s24  }
  0x17   :  { %s562_s30 = smov [#allocation7]  }
  0x18   :  { %s42_s6 = sshll.u32 %s562_s30, 4  ;;  %s43_s6 = int_to_ptr.vmem [resolvable:$true] %s42_s6 }
  0x19   :  { %s520_s7 = scalar_lea.vmem %s43_s6, 1024  ;;  %p525_p11 = scmp.lt.s32.totalorder %s43_s6, %s43_s6 }
  0x1a   :  { %p521_p10 = scmp.ne.s32.totalorder %s43_s6, %s520_s7  ;;  %p526_p12 = scmp.lt.s32.totalorder %s520_s7, %s520_s7 }
  0x1c   :  { %p527_p13 = por %p526_p12, %p525_p11 }
  0x1e   :  { %p528_p0 = pnand %p527_p13, %p521_p10 }
  0x20   :  { %531 = shalt.err (!%p528_p0)
}
  0x21   :  { %48 = dma.hbm_to_vmem [thread:$0]  %s618_s2, 1024, %s43_s6, [#allocation6], %s560_s23, %s560_s23, %s561_s24  }
  0x22   :  { %552 = dma.done.wait [#allocation3], 128  }
  0x23   :  { %553 = vsyncadd [#allocation3], 4294967168 }
  0x24   :  { %554 = dma.done.wait [#allocation6], 2048  }
  0x25   :  { %555 = vsyncadd [#allocation6], 4294965248  ;;  %v563_v0 = vmov 0.0   ;;  %vm564_vm0 = vmmov 0   ;;  %v447_v1 = vld [vmem:[#allocation5 + $0x38] sm:$0xff]   ;;  %v448_v2 = vld [vmem:[#allocation5 + $0x30] sm:$0xff]  }
  0x26   :  { %397 = vmatprep.subr.bf16.mxu0 %v563_v0  ;;  %413 = vmatprep.mubr.msk.bf16.mxu0 %vm564_vm0, %v563_v0  ;;  %v449_v3 = vld [vmem:[#allocation5 + $0x28] sm:$0xff]   ;;  %v450_v4 = vld [vmem:[#allocation5 + $0x20] sm:$0xff]   ;;  %v456_v5 = vld [vmem:[#allocation7 + $0x38] sm:$0xff]   ;;  %s565_s11 = smov [#allocation8]  }
  0x27   :  { %417 = vmatprep.subr.bf16.mxu1 %v563_v0  ;;  %433 = vmatprep.mubr.msk.bf16.mxu1 %vm564_vm0, %v563_v0  ;;  %v451_v6 = vld [vmem:[#allocation5 + $0x18] sm:$0xff]   ;;  %v452_v7 = vld [vmem:[#allocation5 + $0x10] sm:$0xff]   ;;  %v453_v8 = vld [vmem:[#allocation5 + $0x8] sm:$0xff]   ;;  %s347_s12 = sshll.u32 %s565_s11, 4  ;;  %s348_s12 = int_to_ptr.vmem [resolvable:$true] %s347_s12 }
  0x28   :  { %398 = vmatpush3.bf16.msra.mxu0 %v447_v1  ;;  %418 = vmatpush3.bf16.msra.mxu1 %v456_v5  ;;  %v454_v9 = vld [vmem:[#allocation5] sm:$0xff]   ;;  %v455_v10 = vld [vmem:[#allocation2] sm:$0xff]   ;;  %v457_v11 = vld [vmem:[#allocation7 + $0x30] sm:$0xff]   ;;  %s532_s13 = scalar_lea.vmem %s348_s12, 256  ;;  %p537_p2 = scmp.lt.s32.totalorder %s348_s12, %s348_s12 }
  0x29   :  { %399 = vmatprep.subr.bf16.mxu0 %v563_v0  ;;  %419 = vmatprep.subr.bf16.mxu1 %v563_v0  ;;  %v458_v12 = vld [vmem:[#allocation7 + $0x28] sm:$0xff]   ;;  %v459_v13 = vld [vmem:[#allocation7 + $0x20] sm:$0xff]   ;;  %v460_v14 = vld [vmem:[#allocation7 + $0x18] sm:$0xff]   ;;  %p533_p1 = scmp.ne.s32.totalorder %s348_s12, %s532_s13  ;;  %p538_p3 = scmp.lt.s32.totalorder %s532_s13, %s532_s13 }
  0x2a   :  { %v461_v15 = vld [vmem:[#allocation7 + $0x10] sm:$0xff]   ;;  %v462_v16 = vld [vmem:[#allocation7 + $0x8] sm:$0xff]   ;;  %v463_v17 = vld [vmem:[#allocation7] sm:$0xff]  }
  0x2b   :  { %v377_v59 = vld [vmem:[%s619_s3] ss:$0 sm:$0xff]  ;;  %p539_p4 = por %p538_p3, %p537_p2 }
  0x2c   :  { %400 = vmatpush3.bf16.msra.mxu0 %v448_v2  ;;  %420 = vmatpush3.bf16.msra.mxu1 %v457_v11  ;;  %v378_v61 = vld [vmem:[%s620_s4] ss:$0 sm:$0xff] }
  0x2d   :  { %401 = vmatprep.subr.bf16.mxu0 %v563_v0  ;;  %421 = vmatprep.subr.bf16.mxu1 %v563_v0  ;;  %p540_p5 = pnand %p539_p4, %p533_p1 }
  0x30   :  { %402 = vmatpush3.bf16.msra.mxu0 %v449_v3  ;;  %422 = vmatpush3.bf16.msra.mxu1 %v458_v12 }
  0x31   :  { %403 = vmatprep.subr.bf16.mxu0 %v563_v0  ;;  %423 = vmatprep.subr.bf16.mxu1 %v563_v0 }
  0x34   :  { %404 = vmatpush3.bf16.msra.mxu0 %v450_v4  ;;  %424 = vmatpush3.bf16.msra.mxu1 %v459_v13 }
  0x35   :  { %405 = vmatprep.subr.bf16.mxu0 %v563_v0  ;;  %425 = vmatprep.subr.bf16.mxu1 %v563_v0 }
  0x38   :  { %406 = vmatpush3.bf16.msra.mxu0 %v451_v6  ;;  %426 = vmatpush3.bf16.msra.mxu1 %v460_v14 }
  0x39   :  { %407 = vmatprep.subr.bf16.mxu0 %v563_v0  ;;  %427 = vmatprep.subr.bf16.mxu1 %v563_v0 }
  0x3c   :  { %408 = vmatpush3.bf16.msra.mxu0 %v452_v7  ;;  %428 = vmatpush3.bf16.msra.mxu1 %v461_v15 }
  0x3d   :  { %409 = vmatprep.subr.bf16.mxu0 %v563_v0  ;;  %429 = vmatprep.subr.bf16.mxu1 %v563_v0 }
  0x40   :  { %410 = vmatpush3.bf16.msra.mxu0 %v453_v8  ;;  %430 = vmatpush3.bf16.msra.mxu1 %v462_v16 }
  0x41   :  { %411 = vmatprep.subr.bf16.mxu0 %v563_v0  ;;  %431 = vmatprep.subr.bf16.mxu1 %v563_v0 }
  0x44   :  { %412 = vmatpush3.bf16.msra.mxu0 %v454_v9  ;;  %432 = vmatpush3.bf16.msra.mxu1 %v463_v17 }
  0x47   :  { %414 = vmatmul.mubr.bf16.vlgmr.msra.gmra.mxu0 %v455_v10 }
 0x107   :  { %v169_v18 = vpop.f32.mrf.mxu0 }
 0x108   :  { %v178_v19 = vmul.f32 0.70710677, %v169_v18  ;;  %v176_v27 = vmul.f32 0.5, %v169_v18 }
 0x109   :  { %v415_v20 = vpop.f32.mrf.mxu0 }
 0x10a   :  { %464 = verf.f32 %v178_v19 }
 0x10b   :  { %v172_v21 = vpop.f32.mrf.mxu0 }
 0x10c   :  { %v179_v22 = vmul.f32 0.70710677, %v172_v21  ;;  %v177_v28 = vmul.f32 0.5, %v172_v21 }
 0x10d   :  { %v416_v23 = vpop.f32.mrf.mxu0 }
 0x10e   :  { %466 = verf.f32 %v179_v22 }
 0x117   :  { %v465_v24 = vpop.eup %464 }
 0x118   :  { %v182_v25 = vadd.f32 1.0, %v465_v24 }
 0x11a   :  { %v184_v30 = vmul.f32 %v182_v25, %v176_v27 }
 0x11b   :  { %v467_v26 = vpop.eup %466 }
 0x11c   :  { %v183_v29 = vadd.f32 1.0, %v467_v26 }
 0x11e   :  { %v185_v31 = vmul.f32 %v183_v29, %v177_v28 }
 0x120   :  { %v186_v32 = vpack.c.bf16 %v185_v31, %v184_v30 }
 0x122   :  { %434 = vmatmul.mubr.bf16.vlgmr.msra.gmra.mxu1 %v186_v32 }
 0x1e2   :  { %v285_v33 = vpop.f32.mrf.mxu1 }
 0x1e3   :  { %v292_v34 = vadd.f32 %v285_v33, %v169_v18 }
 0x1e4   :  { %v435_v35 = vpop.f32.mrf.mxu1 }
 0x1e5   :  { %294 = vadd.xlane.f32.xlu0 %v292_v34  ;;  %v300_v36 = vmul.f32 %v292_v34, %v292_v34 }
 0x1e6   :  { %v288_v37 = vpop.f32.mrf.mxu1 }
 0x1e7   :  { %v293_v38 = vadd.f32 %v288_v37, %v172_v21  ;;  %302 = vadd.xlane.f32.xlu1 %v300_v36 }
 0x1e8   :  { %v436_v39 = vpop.f32.mrf.mxu1 }
 0x1e9   :  { %296 = vadd.xlane.f32.xlu0 %v293_v38  ;;  %v301_v40 = vmul.f32 %v293_v38, %v293_v38 }
 0x1eb   :  { %304 = vadd.xlane.f32.xlu1 %v301_v40 }
 0x26e   :  { %v295_v41 = vpop.xlane.xlu0 %294 }
 0x26f   :  { %v298_v42 = vmul.f32 0.03125, %v295_v41 }
 0x270   :  { %v303_v43 = vpop.xlane.xlu1 %302 }
 0x271   :  { %v308_v44 = vmul.f32 %v298_v42, %v298_v42  ;;  %v306_v45 = vmul.f32 0.03125, %v303_v43  ;;  %v314_v57 = vsub.f32 %v292_v34, %v298_v42 }
 0x272   :  { %v297_v46 = vpop.xlane.xlu0 %296 }
 0x273   :  { %v310_v47 = vsub.f32 %v306_v45, %v308_v44  ;;  %v299_v48 = vmul.f32 0.03125, %v297_v46 }
 0x274   :  { %v305_v49 = vpop.xlane.xlu1 %304 }
 0x275   :  { %v312_v50 = vmax.f32 %v310_v47, 0.0  ;;  %v309_v51 = vmul.f32 %v299_v48, %v299_v48  ;;  %v307_v52 = vmul.f32 0.03125, %v305_v49  ;;  %v315_v62 = vsub.f32 %v293_v38, %v299_v48 }
 0x277   :  { %v316_v53 = vadd.f32 1e-05, %v312_v50  ;;  %v311_v54 = vsub.f32 %v307_v52, %v309_v51 }
 0x279   :  { %468 = vrsqrt.f32 %v316_v53  ;;  %v313_v55 = vmax.f32 %v311_v54, 0.0 }
 0x27b   :  { %v317_v56 = vadd.f32 1e-05, %v313_v55 }
 0x27d   :  { %470 = vrsqrt.f32 %v317_v56 }
 0x286   :  { %v469_v58 = vpop.eup %468 }
 0x287   :  { %v320_v60 = vmul.f32 %v469_v58, %v314_v57 }
 0x289   :  { %v329_v63 = vmul.f32 %v377_v59, %v320_v60 }
 0x28a   :  { %v471_v0 = vpop.eup %470 }
 0x28b   :  { %v321_v1 = vmul.f32 %v471_v0, %v315_v62  ;;  %v338_v2 = vadd.f32 %v378_v61, %v329_v63 }
 0x28d   :  { %v330_v3 = vmul.f32 %v377_v59, %v321_v1  ;;  %340 = vst [vmem:[#allocation8] sm:$0xff] %v338_v2 }
 0x28f   :  { %v339_v4 = vadd.f32 %v378_v61, %v330_v3 }
 0x291   :  { %341 = vst [vmem:[#allocation8 + $0x8] sm:$0xff] %v339_v4 }
 0x292   :  { %543 = shalt.err (!%p540_p5)
}
 0x293   :  { %s566_s3 = smov 128   ;;  %s567_s4 = smov 8  }
 0x294   :  { %353 = dma.vmem_to_hbm [thread:$0]  %s348_s12, 256, %s621_s5, [#allocation4], %s566_s3, %s566_s3, %s567_s4  }
 0x295   :  { %556 = dma.done.wait [#allocation4], 256  }
 0x296   :  { %557 = vsyncadd [#allocation4], 4294967040 }
 0x297   :  { %357 = vsyncpa [#allocation3], 1 }
 0x298   :  { %358 = vsyncpa [#allocation6], 1 }
 0x299   :  { %359 = vsyncpa [#allocation4], 1 }

</bundles_post_ra>
